<compile_context>
chip_gen: v6e
topology: v6e:2x2x1
jax: 0.10.0
libtpu: 0.0.40
codegen_flags: <defaults>
</compile_context>

<pallas_src>
import jax
import jax.numpy as jnp
from jax.experimental import pallas as pl
from jax.experimental.pallas import tpu as pltpu


def _pick_channels_per_block(C, per_channel_bytes, budget_bytes):
    """Largest divisor of C that keeps >= 2 grid steps (when C >= 2) and keeps the
    double-buffered blocked footprint under the VMEM budget."""
    best = 1
    for cg in range(1, C + 1):
        if C % cg:
            continue
        if C >= 2 and C // cg < 2:      # keep >= 2 grid steps (v7x dual TC + pipelining)
            continue
        if 2 * cg * per_channel_bytes > budget_bytes:
            continue
        best = max(best, cg)
    return best


def linear_conductive(x, w_tx, b_tx, w_rx, b_rx, gamma, beta, *,
                      channels_per_block=None,
                      matmul_dtype=jnp.bfloat16,
                      vmem_block_budget_bytes=20 * 1024 * 1024,
                      eps=1e-5):
    """Forward pass of LinearConductive.

    x:     [B, C, S_in, 2]   (I/Q in the last dim)
    w_tx:  [C, S_out, S_in], b_tx: [C, S_out]    per-channel Txa filter
    w_rx:  [C, S_out, S_out], b_rx: [C, S_out]   per-channel Rxa filter
    gamma, beta: [C]                              BatchNorm1d affine parameters
    Returns [B, C, 2*S_out] (BatchNorm1d training-mode output).
    """
    B, C, S_in, _ = x.shape
    S_out = w_tx.shape[1]
    f32 = jnp.float32
    mdt = matmul_dtype
    mdt_bytes = jnp.dtype(mdt).itemsize

    # ---- wrapper-side input/weight preparation (plain JAX) --------------------------------
    # x -> channel-major, I rows stacked on Q rows: [C, 2B, S_in]; cast first so the HBM
    # round trip of the transpose is in matmul_dtype (half bytes when bf16).
    x_k = jnp.transpose(x.astype(mdt), (1, 3, 0, 2)).reshape(C, 2 * B, S_in)
    # Txa weight pre-transposed for x @ W: [C, S_in, S_out].
    wtx_k = jnp.transpose(w_tx, (0, 2, 1)).astype(mdt)
    # Rxa weight pre-transposed with the I/Q interleave folded in:
    #   W_ev[c, s, 2t]   = w_rx[c, t, s]   (even output lanes <- I rows)
    #   W_od[c, s, 2t+1] = w_rx[c, t, s]   (odd  output lanes <- Q rows)
    wrx_t = jnp.transpose(w_rx, (0, 2, 1)).astype(f32)                    # [C, S_out, S_out]
    w_ev = jnp.zeros((C, S_out, 2 * S_out), f32).at[:, :, 0::2].set(wrx_t).astype(mdt)
    w_od = jnp.zeros((C, S_out, 2 * S_out), f32).at[:, :, 1::2].set(wrx_t).astype(mdt)
    # Biases kept in f32 and added after the f32 accumulation.
    btx_k = b_tx.astype(f32)                                              # [C, S_out]
    brx_k = jnp.repeat(b_rx.astype(f32), 2, axis=1)                       # [C, 2*S_out] interleaved
    gamma_k = gamma.astype(f32)                                           # [C] -> SMEM
    beta_k = beta.astype(f32)                                             # [C] -> SMEM

    # ---- channel-block size / VMEM budgeting ------------------------------------------------
    per_ch = ((2 * B * S_in + S_in * S_out + 2 * S_out * 2 * S_out) * mdt_bytes
              + B * 2 * S_out * 4)                                        # blocked bytes / channel
    if channels_per_block is None:
        channels_per_block = _pick_channels_per_block(C, per_ch, vmem_block_budget_bytes)
    CG = channels_per_block
    assert C % CG == 0, "channels_per_block must divide n_channels"
    resident = (C * S_out + C * 2 * S_out) * 4                            # bias tables (fetched once)
    vmem_limit = int(min(max(32 << 20, 2 * CG * per_ch + 2 * resident + (8 << 20)), 60 << 20))
    inv_n = 1.0 / float(2 * B * S_out)

    def kernel(gamma_ref, beta_ref, x_ref, wtx_ref, btx_ref, wev_ref, wod_ref,
               brx_ref, o_ref):
        c0 = pl.program_id(0) * CG

        def body(g, carry):
            c = c0 + g
            # ---- Txa filter: one fused I/Q matmul over the 2B stacked rows ------------------
            y = jnp.dot(x_ref[g], wtx_ref[g], preferred_element_type=jnp.float32)
            y = y + btx_ref[pl.ds(c, 1), :]                               # (2B, S_out) f32
            y_i = y[:B]
            y_q = y[B:]
            # ---- CondNlinCore: amp = I^2 + Q^2 ; z = amp * y  (all f32) ---------------------
            amp = y_i * y_i + y_q * y_q                                   # (B, S_out)
            z_i = (amp * y_i).astype(mdt)
            z_q = (amp * y_q).astype(mdt)
            # ---- Rxa filter with the interleave folded into the weights ---------------------
            r = (jnp.dot(z_i, wev_ref[g], preferred_element_type=jnp.float32)
                 + jnp.dot(z_q, wod_ref[g], preferred_element_type=jnp.float32)
                 + brx_ref[pl.ds(c, 1), :])                               # (B, 2*S_out) f32
            # ---- BatchNorm1d (training statistics), centered variance -----------------------
            mean = jnp.sum(r) * inv_n
            d = r - mean
            var = jnp.sum(d * d) * inv_n
            scale = jax.lax.rsqrt(var + eps) * gamma_ref[c]
            shift = beta_ref[c] - mean * scale
            # ---- channel-major store: one contiguous sublane/lane-dense slab ----------------
            o_ref[g] = r * scale + shift
            return carry

        jax.lax.fori_loop(0, CG, body, 0, unroll=min(CG, 2))

    out_cm = pl.pallas_call(
        kernel,
        out_shape=jax.ShapeDtypeStruct((C, B, 2 * S_out), f32),
        grid=(C // CG,),
        in_specs=[
            pl.BlockSpec(memory_space=pltpu.MemorySpace.SMEM),            # gamma [C]
            pl.BlockSpec(memory_space=pltpu.MemorySpace.SMEM),            # beta  [C]
            pl.BlockSpec((CG, 2 * B, S_in), lambda i: (i, 0, 0)),         # x (I/Q stacked rows)
            pl.BlockSpec((CG, S_in, S_out), lambda i: (i, 0, 0)),         # Txa weight (pre-T)
            pl.BlockSpec((C, S_out), lambda i: (0, 0)),                   # Txa bias (resident)
            pl.BlockSpec((CG, S_out, 2 * S_out), lambda i: (i, 0, 0)),    # Rxa weight, even lanes
            pl.BlockSpec((CG, S_out, 2 * S_out), lambda i: (i, 0, 0)),    # Rxa weight, odd lanes
            pl.BlockSpec((C, 2 * S_out), lambda i: (0, 0)),               # Rxa bias (resident)
        ],
        out_specs=pl.BlockSpec((CG, B, 2 * S_out), lambda i: (i, 0, 0)),
        compiler_params=pltpu.CompilerParams(
            dimension_semantics=("parallel",),
            vmem_limit_bytes=vmem_limit),
    )(gamma_k, beta_k, x_k, wtx_k, btx_k, w_ev, w_od, brx_k)

    # Restore the module's [B, C, 2*S_out] layout (small relative to weight traffic).
    return jnp.transpose(out_cm, (1, 0, 2))


def _reference(x, w_tx, b_tx, w_rx, b_rx, gamma, beta):
    """Pure-JAX f32 reference of the same forward pass."""
    y = jnp.einsum('bcsq,cts->bctq', x, w_tx) + b_tx[None, :, :, None]
    amp = y[..., 0] ** 2 + y[..., 1] ** 2
    z = amp[..., None] * y
    r = jnp.einsum('bcsq,cts->bctq', z, w_rx) + b_rx[None, :, :, None]
    B, C, S_out, _ = r.shape
    r = r.reshape(B, C, 2 * S_out)
    mean = jnp.mean(r, axis=(0, 2), keepdims=True)
    var = jnp.mean((r - mean) ** 2, axis=(0, 2), keepdims=True)
    rn = (r - mean) * jax.lax.rsqrt(var + 1e-5)
    return rn * gamma[None, :, None] + beta[None, :, None]


if __name__ == "__main__":
    B, C, S_in, S_out = 2, 4, 16, 8

    key = jax.random.PRNGKey(0)
    k_x, k_wtx, k_btx, k_wrx, k_brx, k_g, k_b = jax.random.split(key, 7)

    x = jax.random.normal(k_x, (B, C, S_in, 2), dtype=jnp.float32)
    w_tx = 0.1 * jax.random.normal(k_wtx, (C, S_out, S_in), dtype=jnp.float32)
    b_tx = 0.1 * jax.random.normal(k_btx, (C, S_out), dtype=jnp.float32)
    w_rx = 0.1 * jax.random.normal(k_wrx, (C, S_out, S_out), dtype=jnp.float32)
    b_rx = 0.1 * jax.random.normal(k_brx, (C, S_out), dtype=jnp.float32)
    gamma = 1.0 + 0.1 * jax.random.normal(k_g, (C,), dtype=jnp.float32)
    beta = 0.1 * jax.random.normal(k_b, (C,), dtype=jnp.float32)

    ref = _reference(x, w_tx, b_tx, w_rx, b_rx, gamma, beta)

    # Exact-semantics check: f32 MXU operands.
    out_f32 = jax.block_until_ready(
        linear_conductive(x, w_tx, b_tx, w_rx, b_rx, gamma, beta,
                          matmul_dtype=jnp.float32))
    assert out_f32.shape == (B, C, 2 * S_out)
    assert jnp.allclose(out_f32, ref, rtol=2e-3, atol=2e-3), "f32 path mismatch vs reference"

    # Default fast path: bf16 MXU operands, f32 accumulation / BN math (loose tolerance:
    # the amp = I^2 + Q^2 nonlinearity amplifies bf16 operand rounding).
    out_bf16 = jax.block_until_ready(
        linear_conductive(x, w_tx, b_tx, w_rx, b_rx, gamma, beta))
    assert out_bf16.shape == (B, C, 2 * S_out)
    assert jnp.allclose(out_bf16, ref, rtol=1.5e-1, atol=1.5e-1), "bf16 path mismatch vs reference"

    print("KERNEL_OK")
</pallas_src>

<mosaic_0001>
module attributes {stable_mosaic.version = 11 : i64} {
  func.func @kernel(%arg0: i32, %arg1: memref<4xf32, #tpu.memory_space<smem>>, %arg2: memref<4xf32, #tpu.memory_space<smem>>, %arg3: memref<2x4x16xf32, #tpu.memory_space<vmem>>, %arg4: memref<2x16x8xf32, #tpu.memory_space<vmem>>, %arg5: memref<4x8xf32, #tpu.memory_space<vmem>>, %arg6: memref<2x8x16xf32, #tpu.memory_space<vmem>>, %arg7: memref<2x8x16xf32, #tpu.memory_space<vmem>>, %arg8: memref<4x16xf32, #tpu.memory_space<vmem>>, %arg9: memref<2x2x16xf32, #tpu.memory_space<vmem>>) attributes {dimension_semantics = [#tpu.dimension_semantics<parallel>], iteration_bounds = array<i64: 2>, scalar_prefetch = 0 : i64, scratch_operands = 0 : i64, tpu.core_type = #tpu.core_type<tc>, window_params = [{transform_indices = @transform_0, window_bounds = array<i64: 4>}, {transform_indices = @transform_1, window_bounds = array<i64: 4>}, {transform_indices = @transform_2, window_bounds = array<i64: 2, 4, 16>}, {transform_indices = @transform_3, window_bounds = array<i64: 2, 16, 8>}, {pipeline_mode = #tpu.pipeline_mode<synchronous>, transform_indices = @transform_4, window_bounds = array<i64: 4, 8>}, {transform_indices = @transform_5, window_bounds = array<i64: 2, 8, 16>}, {transform_indices = @transform_6, window_bounds = array<i64: 2, 8, 16>}, {pipeline_mode = #tpu.pipeline_mode<synchronous>, transform_indices = @transform_7, window_bounds = array<i64: 4, 16>}, {transform_indices = @transform_8, window_bounds = array<i64: 2, 2, 16>}]} {
    %c2_i32 = arith.constant 2 : i32
    %0 = arith.muli %arg0, %c2_i32 : i32
    %c0_i32 = arith.constant 0 : i32
    %1 = arith.addi %0, %c0_i32 : i32
    %2 = arith.index_cast %c0_i32 : i32 to index
    %c0 = arith.constant 0 : index
    %c0_0 = arith.constant 0 : index
    %3 = vector.load %arg3[%2, %c0, %c0_0] : memref<2x4x16xf32, #tpu.memory_space<vmem>>, vector<1x4x16xf32>
    %4 = vector.shape_cast %3 : vector<1x4x16xf32> to vector<4x16xf32>
    %5 = arith.index_cast %c0_i32 : i32 to index
    %c0_1 = arith.constant 0 : index
    %c0_2 = arith.constant 0 : index
    %6 = vector.load %arg4[%5, %c0_1, %c0_2] : memref<2x16x8xf32, #tpu.memory_space<vmem>>, vector<1x16x8xf32>
    %7 = vector.shape_cast %6 : vector<1x16x8xf32> to vector<16x8xf32>
    %cst = arith.constant dense<0.000000e+00> : vector<4x8xf32>
    %8 = tpu.matmul %4, %7, %cst {dimension_numbers = #tpu.dot_dimension_numbers<[1], [0], [0], [1], [0, 0, 1, 1], [], []>} : vector<4x16xf32>, vector<16x8xf32>, vector<4x8xf32> -> vector<4x8xf32>
    %9 = arith.index_cast %1 : i32 to index
    %c0_3 = arith.constant 0 : index
    %10 = vector.load %arg5[%9, %c0_3] : memref<4x8xf32, #tpu.memory_space<vmem>>, vector<1x8xf32>
    %11 = vector.broadcast %10 : vector<1x8xf32> to vector<4x8xf32>
    %12 = arith.addf %8, %11 : vector<4x8xf32>
    %13 = vector.extract_strided_slice %12 {offsets = [0, 0], sizes = [2, 8], strides = [1, 1]} : vector<4x8xf32> to vector<2x8xf32>
    %14 = vector.extract_strided_slice %12 {offsets = [2, 0], sizes = [2, 8], strides = [1, 1]} : vector<4x8xf32> to vector<2x8xf32>
    %15 = arith.mulf %13, %13 : vector<2x8xf32>
    %16 = arith.mulf %14, %14 : vector<2x8xf32>
    %17 = arith.addf %15, %16 : vector<2x8xf32>
    %18 = arith.mulf %17, %13 : vector<2x8xf32>
    %19 = arith.mulf %17, %14 : vector<2x8xf32>
    %20 = arith.index_cast %c0_i32 : i32 to index
    %c0_4 = arith.constant 0 : index
    %c0_5 = arith.constant 0 : index
    %21 = vector.load %arg6[%20, %c0_4, %c0_5] : memref<2x8x16xf32, #tpu.memory_space<vmem>>, vector<1x8x16xf32>
    %22 = vector.shape_cast %21 : vector<1x8x16xf32> to vector<8x16xf32>
    %cst_6 = arith.constant dense<0.000000e+00> : vector<2x16xf32>
    %23 = tpu.matmul %18, %22, %cst_6 {dimension_numbers = #tpu.dot_dimension_numbers<[1], [0], [0], [1], [0, 0, 1, 1], [], []>} : vector<2x8xf32>, vector<8x16xf32>, vector<2x16xf32> -> vector<2x16xf32>
    %24 = arith.index_cast %c0_i32 : i32 to index
    %c0_7 = arith.constant 0 : index
    %c0_8 = arith.constant 0 : index
    %25 = vector.load %arg7[%24, %c0_7, %c0_8] : memref<2x8x16xf32, #tpu.memory_space<vmem>>, vector<1x8x16xf32>
    %26 = vector.shape_cast %25 : vector<1x8x16xf32> to vector<8x16xf32>
    %cst_9 = arith.constant dense<0.000000e+00> : vector<2x16xf32>
    %27 = tpu.matmul %19, %26, %cst_9 {dimension_numbers = #tpu.dot_dimension_numbers<[1], [0], [0], [1], [0, 0, 1, 1], [], []>} : vector<2x8xf32>, vector<8x16xf32>, vector<2x16xf32> -> vector<2x16xf32>
    %28 = arith.addf %23, %27 : vector<2x16xf32>
    %29 = arith.index_cast %1 : i32 to index
    %c0_10 = arith.constant 0 : index
    %30 = vector.load %arg8[%29, %c0_10] : memref<4x16xf32, #tpu.memory_space<vmem>>, vector<1x16xf32>
    %31 = vector.broadcast %30 : vector<1x16xf32> to vector<2x16xf32>
    %32 = arith.addf %28, %31 : vector<2x16xf32>
    %33 = vector.shape_cast %32 : vector<2x16xf32> to vector<1x2x16xf32>
    %cst_11 = arith.constant dense<0.000000e+00> : vector<1xf32>
    %34 = vector.multi_reduction <add>, %33, %cst_11 [1, 2] : vector<1x2x16xf32> to vector<1xf32>
    %35 = vector.shape_cast %34 : vector<1xf32> to vector<1x1x1xf32>
    %36 = vector.extract %35[0, 0, 0] : f32 from vector<1x1x1xf32>
    %cst_12 = arith.constant 3.125000e-02 : f32
    %37 = arith.mulf %36, %cst_12 : f32
    %38 = vector.broadcast %37 : f32 to vector<2x16xf32>
    %39 = arith.subf %32, %38 : vector<2x16xf32>
    %40 = arith.mulf %39, %39 : vector<2x16xf32>
    %41 = vector.shape_cast %40 : vector<2x16xf32> to vector<1x2x16xf32>
    %cst_13 = arith.constant dense<0.000000e+00> : vector<1xf32>
    %42 = vector.multi_reduction <add>, %41, %cst_13 [1, 2] : vector<1x2x16xf32> to vector<1xf32>
    %43 = vector.shape_cast %42 : vector<1xf32> to vector<1x1x1xf32>
    %44 = vector.extract %43[0, 0, 0] : f32 from vector<1x1x1xf32>
    %cst_14 = arith.constant 3.125000e-02 : f32
    %45 = arith.mulf %44, %cst_14 : f32
    %cst_15 = arith.constant 9.99999974E-6 : f32
    %46 = arith.addf %45, %cst_15 : f32
    %47 = math.rsqrt %46 : f32
    %48 = arith.index_cast %1 : i32 to index
    %49 = memref.load %arg1[%48] : memref<4xf32, #tpu.memory_space<smem>>
    %50 = arith.mulf %47, %49 : f32
    %51 = arith.index_cast %1 : i32 to index
    %52 = memref.load %arg2[%51] : memref<4xf32, #tpu.memory_space<smem>>
    %53 = arith.mulf %37, %50 : f32
    %54 = arith.subf %52, %53 : f32
    %55 = vector.broadcast %50 : f32 to vector<2x16xf32>
    %56 = arith.mulf %32, %55 : vector<2x16xf32>
    %57 = vector.broadcast %54 : f32 to vector<2x16xf32>
    %58 = arith.addf %56, %57 : vector<2x16xf32>
    %59 = arith.index_cast %c0_i32 : i32 to index
    %c0_16 = arith.constant 0 : index
    %c0_17 = arith.constant 0 : index
    %60 = vector.load %arg9[%59, %c0_16, %c0_17] : memref<2x2x16xf32, #tpu.memory_space<vmem>>, vector<1x2x16xf32>
    %61 = vector.shape_cast %60 : vector<1x2x16xf32> to vector<2x16xf32>
    %62 = vector.shape_cast %58 : vector<2x16xf32> to vector<1x2x16xf32>
    tpu.vector_store %arg9[%59, %c0_16, %c0_17], %62 {strides = array<i32>} : memref<2x2x16xf32, #tpu.memory_space<vmem>>, vector<1x2x16xf32>,
    %c1_i32 = arith.constant 1 : i32
    %63 = arith.addi %0, %c1_i32 : i32
    %64 = arith.index_cast %c1_i32 : i32 to index
    %c0_18 = arith.constant 0 : index
    %c0_19 = arith.constant 0 : index
    %65 = vector.load %arg3[%64, %c0_18, %c0_19] : memref<2x4x16xf32, #tpu.memory_space<vmem>>, vector<1x4x16xf32>
    %66 = vector.shape_cast %65 : vector<1x4x16xf32> to vector<4x16xf32>
    %67 = arith.index_cast %c1_i32 : i32 to index
    %c0_20 = arith.constant 0 : index
    %c0_21 = arith.constant 0 : index
    %68 = vector.load %arg4[%67, %c0_20, %c0_21] : memref<2x16x8xf32, #tpu.memory_space<vmem>>, vector<1x16x8xf32>
    %69 = vector.shape_cast %68 : vector<1x16x8xf32> to vector<16x8xf32>
    %cst_22 = arith.constant dense<0.000000e+00> : vector<4x8xf32>
    %70 = tpu.matmul %66, %69, %cst_22 {dimension_numbers = #tpu.dot_dimension_numbers<[1], [0], [0], [1], [0, 0, 1, 1], [], []>} : vector<4x16xf32>, vector<16x8xf32>, vector<4x8xf32> -> vector<4x8xf32>
    %71 = arith.index_cast %63 : i32 to index
    %c0_23 = arith.constant 0 : index
    %72 = vector.load %arg5[%71, %c0_23] : memref<4x8xf32, #tpu.memory_space<vmem>>, vector<1x8xf32>
    %73 = vector.broadcast %72 : vector<1x8xf32> to vector<4x8xf32>
    %74 = arith.addf %70, %73 : vector<4x8xf32>
    %75 = vector.extract_strided_slice %74 {offsets = [0, 0], sizes = [2, 8], strides = [1, 1]} : vector<4x8xf32> to vector<2x8xf32>
    %76 = vector.extract_strided_slice %74 {offsets = [2, 0], sizes = [2, 8], strides = [1, 1]} : vector<4x8xf32> to vector<2x8xf32>
    %77 = arith.mulf %75, %75 : vector<2x8xf32>
    %78 = arith.mulf %76, %76 : vector<2x8xf32>
    %79 = arith.addf %77, %78 : vector<2x8xf32>
    %80 = arith.mulf %79, %75 : vector<2x8xf32>
    %81 = arith.mulf %79, %76 : vector<2x8xf32>
    %82 = arith.index_cast %c1_i32 : i32 to index
    %c0_24 = arith.constant 0 : index
    %c0_25 = arith.constant 0 : index
    %83 = vector.load %arg6[%82, %c0_24, %c0_25] : memref<2x8x16xf32, #tpu.memory_space<vmem>>, vector<1x8x16xf32>
    %84 = vector.shape_cast %83 : vector<1x8x16xf32> to vector<8x16xf32>
    %cst_26 = arith.constant dense<0.000000e+00> : vector<2x16xf32>
    %85 = tpu.matmul %80, %84, %cst_26 {dimension_numbers = #tpu.dot_dimension_numbers<[1], [0], [0], [1], [0, 0, 1, 1], [], []>} : vector<2x8xf32>, vector<8x16xf32>, vector<2x16xf32> -> vector<2x16xf32>
    %86 = arith.index_cast %c1_i32 : i32 to index
    %c0_27 = arith.constant 0 : index
    %c0_28 = arith.constant 0 : index
    %87 = vector.load %arg7[%86, %c0_27, %c0_28] : memref<2x8x16xf32, #tpu.memory_space<vmem>>, vector<1x8x16xf32>
    %88 = vector.shape_cast %87 : vector<1x8x16xf32> to vector<8x16xf32>
    %cst_29 = arith.constant dense<0.000000e+00> : vector<2x16xf32>
    %89 = tpu.matmul %81, %88, %cst_29 {dimension_numbers = #tpu.dot_dimension_numbers<[1], [0], [0], [1], [0, 0, 1, 1], [], []>} : vector<2x8xf32>, vector<8x16xf32>, vector<2x16xf32> -> vector<2x16xf32>
    %90 = arith.addf %85, %89 : vector<2x16xf32>
    %91 = arith.index_cast %63 : i32 to index
    %c0_30 = arith.constant 0 : index
    %92 = vector.load %arg8[%91, %c0_30] : memref<4x16xf32, #tpu.memory_space<vmem>>, vector<1x16xf32>
    %93 = vector.broadcast %92 : vector<1x16xf32> to vector<2x16xf32>
    %94 = arith.addf %90, %93 : vector<2x16xf32>
    %95 = vector.shape_cast %94 : vector<2x16xf32> to vector<1x2x16xf32>
    %cst_31 = arith.constant dense<0.000000e+00> : vector<1xf32>
    %96 = vector.multi_reduction <add>, %95, %cst_31 [1, 2] : vector<1x2x16xf32> to vector<1xf32>
    %97 = vector.shape_cast %96 : vector<1xf32> to vector<1x1x1xf32>
    %98 = vector.extract %97[0, 0, 0] : f32 from vector<1x1x1xf32>
    %cst_32 = arith.constant 3.125000e-02 : f32
    %99 = arith.mulf %98, %cst_32 : f32
    %100 = vector.broadcast %99 : f32 to vector<2x16xf32>
    %101 = arith.subf %94, %100 : vector<2x16xf32>
    %102 = arith.mulf %101, %101 : vector<2x16xf32>
    %103 = vector.shape_cast %102 : vector<2x16xf32> to vector<1x2x16xf32>
    %cst_33 = arith.constant dense<0.000000e+00> : vector<1xf32>
    %104 = vector.multi_reduction <add>, %103, %cst_33 [1, 2] : vector<1x2x16xf32> to vector<1xf32>
    %105 = vector.shape_cast %104 : vector<1xf32> to vector<1x1x1xf32>
    %106 = vector.extract %105[0, 0, 0] : f32 from vector<1x1x1xf32>
    %cst_34 = arith.constant 3.125000e-02 : f32
    %107 = arith.mulf %106, %cst_34 : f32
    %cst_35 = arith.constant 9.99999974E-6 : f32
    %108 = arith.addf %107, %cst_35 : f32
    %109 = math.rsqrt %108 : f32
    %110 = arith.index_cast %63 : i32 to index
    %111 = memref.load %arg1[%110] : memref<4xf32, #tpu.memory_space<smem>>
    %112 = arith.mulf %109, %111 : f32
    %113 = arith.index_cast %63 : i32 to index
    %114 = memref.load %arg2[%113] : memref<4xf32, #tpu.memory_space<smem>>
    %115 = arith.mulf %99, %112 : f32
    %116 = arith.subf %114, %115 : f32
    %117 = vector.broadcast %112 : f32 to vector<2x16xf32>
    %118 = arith.mulf %94, %117 : vector<2x16xf32>
    %119 = vector.broadcast %116 : f32 to vector<2x16xf32>
    %120 = arith.addf %118, %119 : vector<2x16xf32>
    %121 = arith.index_cast %c1_i32 : i32 to index
    %c0_36 = arith.constant 0 : index
    %c0_37 = arith.constant 0 : index
    %122 = vector.load %arg9[%121, %c0_36, %c0_37] : memref<2x2x16xf32, #tpu.memory_space<vmem>>, vector<1x2x16xf32>
    %123 = vector.shape_cast %122 : vector<1x2x16xf32> to vector<2x16xf32>
    %124 = vector.shape_cast %120 : vector<2x16xf32> to vector<1x2x16xf32>
    tpu.vector_store %arg9[%121, %c0_36, %c0_37], %124 {strides = array<i32>} : memref<2x2x16xf32, #tpu.memory_space<vmem>>, vector<1x2x16xf32>,
    %c2_i32_38 = arith.constant 2 : i32
    return
  }
  func.func @transform_0(%arg0: i32) -> i32 {
    %c0_i32 = arith.constant 0 : i32
    %c0_i32_0 = arith.constant 0 : i32
    return %c0_i32 : i32
  }
  func.func @transform_1(%arg0: i32) -> i32 {
    %c0_i32 = arith.constant 0 : i32
    %c0_i32_0 = arith.constant 0 : i32
    return %c0_i32 : i32
  }
  func.func @transform_2(%arg0: i32) -> (i32, i32, i32) {
    %c0_i32 = arith.constant 0 : i32
    %c0_i32_0 = arith.constant 0 : i32
    %c0_i32_1 = arith.constant 0 : i32
    return %arg0, %c0_i32, %c0_i32_0 : i32, i32, i32
  }
  func.func @transform_3(%arg0: i32) -> (i32, i32, i32) {
    %c0_i32 = arith.constant 0 : i32
    %c0_i32_0 = arith.constant 0 : i32
    %c0_i32_1 = arith.constant 0 : i32
    return %arg0, %c0_i32, %c0_i32_0 : i32, i32, i32
  }
  func.func @transform_4(%arg0: i32) -> (i32, i32) {
    %c0_i32 = arith.constant 0 : i32
    %c0_i32_0 = arith.constant 0 : i32
    %c0_i32_1 = arith.constant 0 : i32
    return %c0_i32, %c0_i32_0 : i32, i32
  }
  func.func @transform_5(%arg0: i32) -> (i32, i32, i32) {
    %c0_i32 = arith.constant 0 : i32
    %c0_i32_0 = arith.constant 0 : i32
    %c0_i32_1 = arith.constant 0 : i32
    return %arg0, %c0_i32, %c0_i32_0 : i32, i32, i32
  }
  func.func @transform_6(%arg0: i32) -> (i32, i32, i32) {
    %c0_i32 = arith.constant 0 : i32
    %c0_i32_0 = arith.constant 0 : i32
    %c0_i32_1 = arith.constant 0 : i32
    return %arg0, %c0_i32, %c0_i32_0 : i32, i32, i32
  }
  func.func @transform_7(%arg0: i32) -> (i32, i32) {
    %c0_i32 = arith.constant 0 : i32
    %c0_i32_0 = arith.constant 0 : i32
    %c0_i32_1 = arith.constant 0 : i32
    return %c0_i32, %c0_i32_0 : i32, i32
  }
  func.func @transform_8(%arg0: i32) -> (i32, i32, i32) {
    %c0_i32 = arith.constant 0 : i32
    %c0_i32_0 = arith.constant 0 : i32
    %c0_i32_1 = arith.constant 0 : i32
    return %arg0, %c0_i32, %c0_i32_0 : i32, i32, i32
  }
}

</mosaic_0001>

<bundles_post_ra>
// kernel: tpu_custom_call.1
= control target key start
LH: loop header
LB: loop body
LE: loop exit
PB: predicated region body
PF: predicated region fallthrough
CT: control target
= control target key end

     0   :  { %s1671_s0 = inlined_call_operand.vmem [shape: f32[4], index: 0, kind: input, shape index: {}]   ;;  %s1672_s1 = inlined_call_operand.vmem [shape: f32[4], index: 1, kind: input, shape index: {}]   ;;  %s1673_s2 = inlined_call_operand.vmem [shape: f32[4,4,16], index: 2, kind: input, shape index: {}]   ;;  %s1674_s3 = inlined_call_operand.vmem [shape: f32[4,16,8], index: 3, kind: input, shape index: {}]   ;;  %s1675_s4 = inlined_call_operand.vmem [shape: f32[4,8], index: 4, kind: input, shape index: {}]   ;;  %s1676_s5 = inlined_call_operand.vmem [shape: f32[4,8,16], index: 5, kind: input, shape index: {}]   ;;  %s1677_s6 = inlined_call_operand.vmem [shape: f32[4,8,16], index: 6, kind: input, shape index: {}]   ;;  %s1678_s7 = inlined_call_operand.vmem [shape: f32[4,16], index: 7, kind: input, shape index: {}]   ;;  %s1679_s8 = inlined_call_operand.hbm [shape: f32[4,2,16], index: 8, kind: output, shape index: {}]  }
   0x1   :  { %1684 = sst [smem:[#allocation11_spill]] %s1671_s0 }
   0x2   :  { %1685 = sst [smem:[#allocation12_spill]] %s1672_s1 }
   0x3   :  { %1686 = sst [smem:[#allocation13_spill]] %s1673_s2 }
   0x4   :  { %13 = vsyncpa [#allocation4], 0 }
   0x5   :  { %14 = vsyncpa [#allocation6], 0 }
   0x6   :  { %15 = vsyncpa [#allocation3], 0 }
   0x7   :  { %17 = vsyncpa [#allocation3 + $0x1], 0  ;;  %s1455_s27 = smov 0   ;;  %s1457_s28 = smov 0  }
   0x8   :  { %s1459_s29 = smov 0   ;;  %s1461_s30 = smov 0  }
   0x9 LB: > { %s1476_s9 = sadd.s32 4294967295, %s1401_s30   ;;  %s1129_s10 = sadd.s32 4294967294, %s1401_s30   ;;  %s1401_s30 = sphi %s1461_s30, %s1705_s30   ;;  %s1397_s29 = sphi %s1459_s29, %s1704_s29   ;;  %s1393_s28 = sphi %s1457_s28, %s1703_s28   ;;  %s1389_s27 = sphi %s1455_s27, %s1702_s27  }
   0xa   : > { %s1480_s11 = sadd.s32 1, %s1401_s30   ;;  %s218_s12 = sadd.s32 1, %s1397_s29 }
   0xb   : > { %s215_s13 = ssub.s32 %s1401_s30, %s1480_s11  ;;  %p228_p0 = scmp.ne.s32.totalorder %s1397_s29, %s1393_s28 }
   0xc   : > { %p216_p1 = scmp.eq.s32.totalorder %s215_s13, 0  ;;  %p229_p2 = scmp.eq.s32.totalorder %s1476_s9, 1 }
   0xd   : > { %p234_p3 = scmp.ne.s32.totalorder %s1393_s28, %s1389_s27  ;;  %p235_p4 = scmp.eq.s32.totalorder %s1129_s10, 1 }
   0xe   : > { %s1491_s14 = scalar_select %p216_p1, %s1397_s29, %s218_s12  }
   0xf   : > { %p1493_p5 = por %p229_p2, %p228_p0  ;;  %p1497_p6 = por %p235_p4, %p234_p3 }
  0x10   : > { %p1130_p7 = scmp.ge.s32.totalorder %s1401_s30, 1  ;;  %p242_p8 = scmp.lt.s32.totalorder %s1401_s30, 3 }
  0x11   : > { %s1687_s15 = scalar_select %p1493_p5, 1, 0 }
  0x12   : > { %s1688_s16 = scalar_select %p1497_p6, 1, 0 }
  0x13   : > { %p1680_p9 = scmp.eq.s32.totalorder %s1476_s9, 0  ;;  %p1504_p10 = pnand %p1130_p7, %p242_p8 }
  0x14   : > { %s1690_s0 = sld [smem:[#allocation11_spill]] }
  0x15   : > { %s1689_s17 = scalar_select %p1504_p10, 1, 0 }
  0x16   : > { %p1245_p11 = pneg %p1504_p10  ;;  %s1691_s1 = sld [smem:[#allocation12_spill]] }
  0x18   : > { %p1518_p12 = pnand %p1680_p9, %p1245_p11 }
  0x1a   : > { %s255_s20 = sshll.u32 %s1690_s0, 4  ;;  %p1305_p0 = pneg %p1518_p12  ;;  %s256_s20 = int_to_ptr.vmem [resolvable:$true] %s255_s20 }
  0x1b   : > { %s1303_s25 = scalar_lea.vmem %s256_s20, 16  ;;  %p1311_p3 = scmp.lt.s32.totalorder %s256_s20, %s256_s20 }
  0x1c   : > { %s266_s23 = sshll.u32 %s1691_s1, 4  ;;  %p1304_p13 = scmp.ne.s32.totalorder %s256_s20, %s1303_s25  ;;  %s267_s23 = int_to_ptr.vmem [resolvable:$true] %s266_s23 }
  0x1d   : > { %p1312_p4 = scmp.lt.s32.totalorder %s1303_s25, %s1303_s25 }
  0x1e   : > { %p1306_p1 = pnand %p1305_p0, %p1304_p13 }
  0x1f   : > { %p1313_p7 = por %p1312_p4, %p1311_p3 }
  0x20   : > { %p1307_p2 = pneg %p1306_p1 }
  0x22   : > { %p1314_p8 = pnand %p1313_p7, %p1307_p2 }
  0x24   : > { %1317 = shalt.err (!%p1314_p8)
}
  0x25   : > { %s1403_s26 = smov [#allocation2]   ;;  %s1318_s10 = scalar_lea.vmem %s267_s23, 16 }
  0x26   : > { %1248 = dma.vmem_to_smem (!%p1518_p12), %s256_s20, 16, %s1403_s26, [#allocation4]  }
  0x27   : > { %p1319_p11 = scmp.ne.s32.totalorder %s267_s23, %s1318_s10  ;;  %p1326_p5 = scmp.lt.s32.totalorder %s267_s23, %s267_s23 }
  0x28   : > { %p1327_p10 = scmp.lt.s32.totalorder %s1318_s10, %s1318_s10 }
  0x29   : > { %p1321_p9 = pnand %p1319_p11, %p1305_p0 }
  0x2a   : > { %p1328_p13 = por %p1327_p10, %p1326_p5 }
  0x2b   : > { %p1322_p6 = pneg %p1321_p9 }
  0x2d   : > { %p1329_p1 = pnand %p1328_p13, %p1322_p6 }
  0x2f   : > { %1332 = shalt.err (!%p1329_p1)
}
  0x30   : > { %s1404_s12 = smov [#allocation5]   ;;  %p1693_p2 = scmp.ne.s32.totalorder %s1689_s17, 0 }
  0x31   : > { %1251 = dma.vmem_to_smem (!%p1518_p12), %s267_s23, 16, %s1404_s12, [#allocation6]  }
  0x32   : > { %322 = sbr.rel (%p1693_p2) target bundleno = 1261 (0x4ed), region = 52  ;;  %p1694_p3 = scmp.eq.s32.totalorder (!%p1693_p2), %s1476_s9, 0 }
  0x37   : > { %1376 = dma.done.wait (%p1694_p3), [#allocation4], 16   ;;  %p1695_p4 = pmov %p1694_p3 }
  0x38   : > { %p1696_p9 = pmov %p1694_p3 }
  0x39   : > { %1378 = vsyncadd (%p1695_p4), [#allocation4], 4294967280 }
  0x3a   : > { %1380 = dma.done.wait (%p1696_p9), [#allocation6], 16   ;;  %p1697_p5 = pmov %p1694_p3 }
  0x3c   : > { %1382 = vsyncadd (%p1697_p5), [#allocation6], 4294967280 }
  0x3d   : > { %332 = sfence }
  0x3e   : > { %s1539_s13 = sshll.u32 %s1476_s9, 1  ;;  %v1405_v0 = vmov 0.0   ;;  %vm1406_vm0 = vmmov 0   ;;  %s1698_s2 = sld [smem:[#allocation13_spill]]  ;;  %vm413_vm1 = vcmask 130048   ;;  %vm499_vm2 = vcmask 64512  }
  0x3f   : > { %1189 = vmatprep.subr.mxu0 %v1405_v0  ;;  %p378_p6 = scmp.lt.s32.totalorder %s1539_s13, 3  ;;  %1193 = vmatprep.mubr.msk.f32.mxu0 %vm1406_vm0, %v1405_v0  ;;  %s407_s20 = scalar_lea.vmem %s1675_s4, %s1539_s13  ;;  %vm653_vm3 = vcmask 123904  }
  0x40   : > { %1196 = vmatprep.subr.mxu1 %v1405_v0  ;;  %1198 = vmatprep.mubr.msk.f32.mxu1 %vm1406_vm0, %v1405_v0  ;;  %v1148_v8 = vld [vmem:[%s407_s20] ss:$0 sm:$0xff]  ;;  %v1158_v20 = vld [vmem:[%s407_s20 + $0x1] ss:$0 sm:$0xff]  ;;  %s683_s20 = sld [smem:[#allocation2 + %s1539_s13]]  ;;  %s1174_s0 = sshll.u32 %s1476_s9, 6 }
  0x41   : > { %s1545_s17 = scalar_select %p378_p6, %s1539_s13, 3 }
  0x42   : > { %s685_s21 = sld [smem:[#allocation5 + %s1539_s13]]  ;;  %p1700_p12 = scmp.ne.s32.totalorder %s1687_s15, 0 }
  0x43   : > { %s1173_s18 = sshll.u32 %s1545_s17, 4  ;;  %s1139_s19 = sshll.u32 %s1545_s17, 2 }
  0x44   : > { %s388_s22 = scalar_lea.vmem %s1674_s3, %s1173_s18  ;;  %s381_s25 = scalar_lea.vmem %s1698_s2, %s1139_s19 }
  0x45   : > { %v406_v1 = vld [vmem:[%s388_s22 + $0x8] sm:$0xff]  ;;  %v405_v2 = vld [vmem:[%s388_s22] sm:$0xff]  ;;  %s1144_s26 = sshll.u32 %s1545_s17, 3  ;;  %v1155_v5 = vld [vmem:[%s388_s22 + $0x18] sm:$0xff] }
  0x46   : > { %1190 = vmatpush3.msra.mxu0 %v406_v1  ;;  %v404_v3 = vld [vmem:[%s381_s25] sm:$0xf]  ;;  %s400_s18 = scalar_lea.vmem %s1677_s6, %s1144_s26  ;;  %v1154_v6 = vld [vmem:[%s388_s22 + $0x10] sm:$0xff]  ;;  %v1153_v7 = vld [vmem:[%s381_s25 + $0x4] sm:$0xf]  ;;  %s394_s23 = scalar_lea.vmem %s1676_s5, %s1144_s26 }
  0x47   : > { %1191 = vmatprep.subr.mxu0 %v1405_v0  ;;  %v498_v4 = vld [vmem:[%s400_s18] sm:$0xff]  ;;  %v1161_v19 = vld [vmem:[%s400_s18 + $0x8] sm:$0xff]  ;;  %s646_s26 = scalar_lea.vmem %s1678_s7, %s1539_s13  ;;  %s1683_s22 = sand.u32 1, %s1393_s28  }
  0x48   : > { %1192 = vmatpush3.msra.mxu0 %v405_v2  ;;  %1197 = vmatpush3.msra.mxu1 %v498_v4  ;;  %v497_v17 = vld [vmem:[%s394_s23] sm:$0xff]  ;;  %v1160_v22 = vld [vmem:[%s394_s23 + $0x8] sm:$0xff] }
  0x49   : > { %1194 = vmatmul.mubr.msk.f32.vlgmr.msra.gmra.mxu0 %vm413_vm1, %v404_v3  ;;  %1206 = vmatprep.subr.mxu0 %v1405_v0  ;;  %v1152_v34 = vld [vmem:[%s646_s26] ss:$0 sm:$0xff]  ;;  %v1166_v41 = vld [vmem:[%s646_s26 + $0x1] ss:$0 sm:$0xff] }
  0x4a   : > { %1210 = vmatprep.mubr.msk.f32.mxu0 %vm1406_vm0, %v1405_v0  ;;  %1201 = vmatprep.subr.mxu1 %v1405_v0 }
  0x4b   : > { %1207 = vmatpush3.msra.mxu0 %v1155_v5 }
  0x4c   : > { %1208 = vmatprep.subr.mxu0 %v1405_v0 }
  0x4d   : > { %1209 = vmatpush3.msra.mxu0 %v1154_v6 }
  0x4e   : > { %1211 = vmatmul.mubr.msk.f32.vlgmr.msra.gmra.mxu0 %vm413_vm1, %v1153_v7  ;;  %1218 = vmatprep.subr.mxu0 %v1405_v0 }
  0x4f   : > { %1220 = vmatprep.mubr.msk.f32.mxu0 %vm1406_vm0, %v1405_v0  ;;  %1219 = vmatpush3.msra.mxu0 %v1160_v22 }
 0x109   : > { %v483_v9 = vpop.f32.mrf.mxu0 }
 0x10a   : > { %v484_v10 = vadd.f32 %v1148_v8, %v483_v9 }
 0x10b   : > { %v1195_v11 = vpop.f32.mrf.mxu0 }
 0x10c   : > { %v487_v12 = vmul.f32 %v484_v10, %v484_v10  ;;  %v494_v15 = vrot.slane %v484_v10, 2 }
 0x10e   : > { %v489_v13 = vrot.slane %v487_v12, 2  ;;  %v774_v21 = vpop.f32.mrf.mxu0 }
 0x10f   : > { %v775_v23 = vadd.f32 %v1158_v20, %v774_v21 }
 0x110   : > { %v491_v14 = vadd.f32 %v489_v13, %v487_v12  ;;  %v1212_v24 = vpop.f32.mrf.mxu0 }
 0x111   : > { %v778_v25 = vmul.f32 %v775_v23, %v775_v23  ;;  %v785_v27 = vrot.slane %v775_v23, 2 }
 0x112   : > { %v496_v16 = vmul.f32 %v494_v15, %v491_v14  ;;  %v492_v18 = vmul.f32 %v491_v14, %v484_v10 }
 0x113   : > { %v780_v26 = vrot.slane %v778_v25, 2 }
 0x114   : > { %1199 = vmatmul.mubr.msk.f32.vlgmr.msra.gmra.mxu1 %vm499_vm2, %v496_v16 }
 0x115   : > { %1202 = vmatpush3.msra.mxu1 %v497_v17  ;;  %1203 = vmatprep.mubr.msk.f32.mxu1 %vm1406_vm0, %v1405_v0  ;;  %v782_v28 = vadd.f32 %v780_v26, %v778_v25 }
 0x116   : > { %1213 = vmatprep.subr.mxu1 %v1405_v0 }
 0x117   : > { %v783_v29 = vmul.f32 %v782_v28, %v775_v23  ;;  %v787_v30 = vmul.f32 %v785_v27, %v782_v28 }
 0x118   : > { %1204 = vmatmul.mubr.msk.f32.vlgmr.msra.gmra.mxu1 %vm499_vm2, %v492_v18 }
 0x119   : > { %1214 = vmatpush3.msra.mxu1 %v1161_v19  ;;  %1215 = vmatprep.mubr.msk.f32.mxu1 %vm1406_vm0, %v1405_v0 }
 0x11a   : > { %1221 = vmatmul.mubr.msk.f32.vlgmr.msra.gmra.mxu0 %vm499_vm2, %v783_v29 }
 0x11c   : > { %1216 = vmatmul.mubr.msk.f32.vlgmr.msra.gmra.mxu1 %vm499_vm2, %v787_v30 }
 0x1d4   : > { %v569_v31 = vpop.f32.mrf.mxu1 }
 0x1d6   : > { %v1200_v32 = vpop.f32.mrf.mxu1 }
 0x1d8   : > { %v642_v33 = vpop.f32.mrf.mxu1 }
 0x1d9   : > { %v643_v35 = vadd.f32 %v642_v33, %v569_v31 }
 0x1da   : > { %v1205_v36 = vpop.f32.mrf.mxu1  ;;  %v934_v40 = vpop.f32.mrf.mxu0 }
 0x1db   : > { %v1580_v37 = vadd.f32 %v1152_v34, %v643_v35 }
 0x1dc   : > { %v861_v39 = vpop.f32.mrf.mxu1  ;;  %v1222_v43 = vpop.f32.mrf.mxu0 }
 0x1dd   : > { %v654_v38 = vsel %vm653_vm3, %v1580_v37, 0.0  ;;  %v935_v42 = vadd.f32 %v934_v40, %v861_v39 }
 0x1de   : > { %655 = vadd.xlane.f32.xlu0 %v654_v38  ;;  %v1217_v44 = vpop.f32.mrf.mxu1 }
 0x1df   : > { %v1584_v45 = vadd.f32 %v1166_v41, %v935_v42 }
 0x1e1   : > { %v945_v46 = vsel %vm653_vm3, %v1584_v45, 0.0 }
 0x1e2   : > { %946 = vadd.xlane.f32.xlu1 %v945_v46 }
 0x267   : > { %v656_v47 = vpop.xlane.xlu0 %655 }
 0x268   : > { %v657_v48 = vrot.slane %v656_v47, 4 }
 0x26a   : > { %v658_v49 = vadd.f32 %v657_v48, %v656_v47 }
 0x26b   : > { %v947_v1 = vpop.xlane.xlu1 %946 }
 0x26c   : > { %v659_v50 = vrot.slane %v658_v49, 2  ;;  %v948_v2 = vrot.slane %v947_v1, 4 }
 0x26e   : > { %v660_v51 = vadd.f32 %v659_v50, %v658_v49  ;;  %v949_v3 = vadd.f32 %v948_v2, %v947_v1 }
 0x270   : > { %v661_v52 = vrot.slane %v660_v51, 1  ;;  %v950_v5 = vrot.slane %v949_v3, 2 }
 0x272   : > { %v662_v53 = vadd.f32 %v661_v52, %v660_v51  ;;  %v951_v6 = vadd.f32 %v950_v5, %v949_v3 }
 0x274   : > { %1223 = vpush %v662_v53  ;;  %v952_v7 = vrot.slane %v951_v6, 1 }
 0x276   : > { %v953_v9 = vadd.f32 %v952_v7, %v951_v6 }
 0x2a5   : > { %s1588_s10 = spop %1223 }
 0x2a6   : > { %s664_s12 = smul.f32 0.03125, %s1588_s10 }
 0x2a8   : > { %v665_v54 = vstv %s664_s12 }
 0x2a9   : > { %v666_v55 = vsub.f32 %v1580_v37, %v665_v54 }
 0x2ab   : > { %v667_v56 = vmul.f32 %v666_v55, %v666_v55 }
 0x2ad   : > { %v668_v57 = vsel %vm653_vm3, %v667_v56, 0.0 }
 0x2ae   : > { %669 = vadd.xlane.f32.xlu0 %v668_v57 }
 0x337   : > { %v670_v58 = vpop.xlane.xlu0 %669 }
 0x338   : > { %v671_v59 = vrot.slane %v670_v58, 4 }
 0x33a   : > { %v672_v60 = vadd.f32 %v671_v59, %v670_v58 }
 0x33c   : > { %v673_v61 = vrot.slane %v672_v60, 2 }
 0x33e   : > { %v674_v62 = vadd.f32 %v673_v61, %v672_v60 }
 0x340   : > { %v675_v63 = vrot.slane %v674_v62, 1 }
 0x342   : > { %v676_v0 = vadd.f32 %v675_v63, %v674_v62 }
 0x344   : > { %1225 = vpush %v676_v0 }
 0x375   : > { %s1226_s18 = spop %1225 }
 0x376   : > { %s678_s19 = smul.f32 0.03125, %s1226_s18 }
 0x378   : > { %s679_s17 = sadd.f32 1e-05, %s678_s19  ;;  %s1137_s19 = sshll.u32 %s1683_s22, 2 }
 0x37a   : > { %v680_v4 = vstv %s679_s17 }
 0x37b   : > { %1299 = vrsqrt.f32 %v680_v4 }
 0x388   : > { %v1300_v8 = vpop.eup %1299 }
 0x389   : > { %1227 = vpush %v1300_v8 }
 0x38a   : > { %1229 = vpush %v953_v9 }
 0x3ba   : > { %s1228_s23 = spop %1227 }
 0x3bb   : > { %s684_s24 = smul.f32 %s1228_s23, %s683_s20  ;;  %s1598_s25 = spop %1229 }
 0x3bc   : > { %s955_s26 = smul.f32 0.03125, %s1598_s25  ;;  %s1610_s20 = scalar_lea.vmem [#allocation7], %s1137_s19 }
 0x3bd   : > { %s686_s18 = smul.f32 %s684_s24, %s664_s12  ;;  %v688_v10 = vstv %s684_s24  ;;  %s693_s23 = sadd.s32 1, %s1539_s13 }
 0x3be   : > { %v956_v11 = vstv %s955_s26  ;;  %v689_v13 = vmul.f32 %v688_v10, %v1580_v37  ;;  %s974_s24 = sld [smem:[#allocation2 + %s693_s23]]  ;;  %s999_s1 = sshll.u32 %s1610_s20, 4  ;;  %s1625_s1 = int_to_ptr.vmem [resolvable:$true] %s999_s1 }
 0x3bf   : > { %s687_s17 = ssub.f32 %s685_s21, %s686_s18  ;;  %v957_v12 = vsub.f32 %v1584_v45, %v956_v11  ;;  %s1699_s13 = sand.u32 1, %s1393_s28  }
 0x3c0   : > { %s976_s18 = sld [smem:[#allocation5 + %s693_s23]]  ;;  %s1631_s9 = scalar_lea.sflag [#allocation3], %s1699_s13 }
 0x3c1   : > { %v690_v14 = vstv %s687_s17  ;;  %v958_v15 = vmul.f32 %v957_v12, %v957_v12 }
 0x3c2   : > { %v691_v16 = vadd.f32 %v690_v14, %v689_v13 }
 0x3c3   : > { %v959_v17 = vsel %vm653_vm3, %v958_v15, 0.0 }
 0x3c4   : > { %692 = vst.msk [vmem:[%s1610_s20] sm:$0x3] %vm653_vm3, %v691_v16  ;;  %960 = vadd.xlane.f32.xlu1 %v959_v17 }
 0x44d   : > { %v961_v18 = vpop.xlane.xlu1 %960 }
 0x44e   : > { %v962_v19 = vrot.slane %v961_v18, 4 }
 0x450   : > { %v963_v20 = vadd.f32 %v962_v19, %v961_v18 }
 0x452   : > { %v964_v21 = vrot.slane %v963_v20, 2 }
 0x454   : > { %v965_v22 = vadd.f32 %v964_v21, %v963_v20 }
 0x456   : > { %v966_v23 = vrot.slane %v965_v22, 1 }
 0x458   : > { %v967_v24 = vadd.f32 %v966_v23, %v965_v22 }
 0x45a   : > { %1231 = vpush %v967_v24 }
 0x48b   : > { %s1232_s10 = spop %1231 }
 0x48c   : > { %s969_s12 = smul.f32 0.03125, %s1232_s10 }
 0x48e   : > { %s970_s21 = sadd.f32 1e-05, %s969_s12 }
 0x490   : > { %v971_v25 = vstv %s970_s21  ;;  %s1623_s21 = scalar_lea.hbm %s1679_s8, %s1174_s0 }
 0x491   : > { %1301 = vrsqrt.f32 %v971_v25 }
 0x49e   : > { %v1302_v26 = vpop.eup %1301 }
 0x49f   : > { %1233 = vpush %v1302_v26 }
 0x4d0   : > { %s1234_s19 = spop %1233 }
 0x4d1   : > { %s975_s17 = smul.f32 %s1234_s19, %s974_s24 }
 0x4d3   : > { %s977_s22 = smul.f32 %s975_s17, %s955_s26  ;;  %v979_v27 = vstv %s975_s17 }
 0x4d4   : > { %v980_v28 = vmul.f32 %v979_v27, %v1584_v45 }
 0x4d5   : > { %s978_s2 = ssub.f32 %s976_s18, %s977_s22  ;;  %s1333_s22 = scalar_lea.vmem %s1625_s1, 64 }
 0x4d6   : > { %p1334_p10 = scmp.ne.s32.totalorder %s1625_s1, %s1333_s22 }
 0x4d7   : > { %v981_v29 = vstv %s978_s2  ;;  %s1407_s2 = smov [#allocation7]  }
 0x4d8   : > { %v982_v30 = vadd.f32 %v981_v29, %v980_v28  ;;  %p1335_p0 = pnand %p1334_p10, %p1700_p12  ;;  %s1337_s25 = sshll.u32 %s1407_s2, 4  ;;  %s1338_s25 = int_to_ptr.vmem [resolvable:$false] %s1337_s25 }
 0x4d9   : > { %s1339_s0 = scalar_lea.vmem %s1338_s25, 128  ;;  %p1340_p8 = scmp.lt.s32.totalorder %s1625_s1, %s1338_s25 }
 0x4da   : > { %1167 = vst.msk [vmem:[%s1610_s20 + $0x2] sm:$0x3] %vm653_vm3, %v982_v30  ;;  %p1336_p7 = pneg %p1335_p0  ;;  %p1341_p11 = scmp.lt.s32.totalorder %s1339_s0, %s1333_s22 }
 0x4dc   : > { %p1342_p13 = por %p1341_p11, %p1340_p8 }
 0x4de   : > { %p1343_p1 = pnand %p1342_p13, %p1336_p7 }
 0x4e0   : > { %1346 = shalt.err (!%p1343_p1)
}
 0x4e1   : > { %s1347_s26 = scalar_lea.hbm %s1623_s21, 64  ;;  %s1351_s24 = scalar_lea.hbm %s1679_s8, 128 }
 0x4e2   : > { %p1348_p2 = scmp.ne.s32.totalorder %s1623_s21, %s1347_s26  ;;  %p1352_p9 = scmp.lt.s32.totalorder %s1623_s21, %s1679_s8 }
 0x4e3   : > { %p1353_p5 = scmp.lt.s32.totalorder %s1351_s24, %s1347_s26 }
 0x4e4   : > { %p1349_p3 = pnand %p1348_p2, %p1700_p12 }
 0x4e5   : > { %p1354_p6 = por %p1353_p5, %p1352_p9 }
 0x4e6   : > { %p1350_p4 = pneg %p1349_p3 }
 0x4e8   : > { %p1355_p10 = pnand %p1354_p6, %p1350_p4 }
 0x4ea   : > { %1358 = shalt.err (!%p1355_p10)
}
 0x4eb   : > { %s1408_s17 = smov 32   ;;  %s1409_s10 = smov 2  }
 0x4ec   : > { %1243 = dma.vmem_to_hbm [thread:$0]  (%p1700_p12), %s1625_s1, 64, %s1623_s21, %s1631_s9, %s1408_s17, %s1408_s17, %s1409_s10  }
 0x4ed PF: > { %p1260_p0 = scmp.ge.s32.totalorder %s1401_s30, 2  ;;  %s1014_s12 = sand.u32 1, %s1389_s27  }
 0x4ee   : > { %p1701_p7 = scmp.ne.s32.totalorder %s1688_s16, 0  ;;  %s1015_s13 = scalar_lea.sflag [#allocation3], %s1014_s12 }
 0x4f0   : > { %p1253_p8 = pnand %p1260_p0, %p1701_p7 }
 0x4f2   : > { %p1254_p11 = pneg %p1253_p8 }
 0x4f4   : > { %1384 = dma.done.wait (%p1254_p11), %s1015_s13, 64  }
 0x4f5   : > { %1386 = vsyncadd (%p1254_p11), %s1015_s13, 4294967232  ;;  %p20_p13 = scmp.ge.s32.totalorder %s1480_s11, 4   ;;  %s1702_s27 = smov %s1393_s28 }
 0x4f6   : > { %s1703_s28 = smov %s1397_s29  ;;  %s1704_s29 = smov %s1491_s14 }
 0x4f7   : > { %s1705_s30 = smov %s1480_s11  ;;  %22 = sbr.rel (!%p20_p13) target bundleno = 9 (0x9), region = 114 }
 0x4fc   :  { %1020 = vsyncpa [#allocation3], 1 }
 0x4fd   :  { %1022 = vsyncpa [#allocation3 + $0x1], 1 }
 0x4fe   :  { %1023 = vsyncpa [#allocation4], 1 }
 0x4ff   :  { %1025 = vsyncpa [#allocation4 + $0x1], 1 }
 0x500   :  { %1026 = vsyncpa [#allocation6], 1 }

</bundles_post_ra>
